<compile_context>
chip_gen: v7x
topology: tpu7x:2x2x1
jax: 0.10.0
libtpu: 0.0.40
codegen_flags: <defaults>
</compile_context>

<pallas_src>
import jax
import jax.numpy as jnp
from jax.experimental import pallas as pl
from jax.experimental.pallas import tpu as pltpu
import numpy as np

LANE = 128        # TPU vreg lane width
SUBLANE = 8       # f32 sublane count
_BATCH_TILE = 512 # batch tile used only when the (padded) batch exceeds it


def _round_up(a, m):
    return (a + m - 1) // m * m


def _hnn_kernel(z_ref, w1_ref, w2_ref, out_ref):
    # s = [x q p 1] @ [W1^T ; b1]                          (TB, Hp) — MXU
    s = jnp.dot(z_ref[...], w1_ref[...], preferred_element_type=jnp.float32)
    t = jnp.tanh(s)                                        # EUP
    g = (t * t - 1.0) * (2.0 * t)                          # tanh''(s) — VPU
    # [qdot | pdot] = g @ (-(w2[:,None] * [Wp*Wx | Wq*Wx]))  (TB, Mp) — MXU
    out_ref[...] = jnp.dot(g, w2_ref[...], preferred_element_type=jnp.float32)


def prepare_params(Wx, Wq, Wp, b1, w2):
    """One-time static weight prep: transpose, pre-multiply, fold b1 / w2 / the
    final negation, zero-pad to lane width. Paid once, outside the call path."""
    H, N = Wx.shape
    Kp = _round_up(3 * N + 1, LANE)     # packed input width (+1 bias column)
    Hp = _round_up(H, LANE)             # hidden width
    Mp = _round_up(2 * N, LANE)         # packed output width

    # First-stage weight: [W1^T ; b1], pre-transposed so the kernel contracts
    # z's last dim against W1_pad's FIRST dim (no in-kernel rhs transpose).
    W1t = jnp.concatenate([Wx, Wq, Wp], axis=1).T.astype(jnp.float32)        # (3N, H)
    W1t = jnp.concatenate([W1t, b1.reshape(1, H).astype(jnp.float32)], axis=0)
    W1_pad = jnp.zeros((Kp, Hp), jnp.float32).at[:3 * N + 1, :H].set(W1t)

    # Second-stage weight: w2 scaling and the final negation folded in.
    # Column order: first N -> qdot = -d2H/(dp_i dx_i), next N -> pdot.
    Wcomb = jnp.concatenate([Wp * Wx, Wq * Wx], axis=1).astype(jnp.float32)  # (H, 2N)
    W2 = -(w2.reshape(H, 1).astype(jnp.float32) * Wcomb)
    W2_pad = jnp.zeros((Hp, Mp), jnp.float32).at[:H, :2 * N].set(W2)

    return W1_pad, W2_pad


@jax.jit
def hnn_1d_wave_separable_forward(x, q, p, W1_pad, W2_pad):
    B, N = x.shape
    Kp, Hp = W1_pad.shape
    Mp = W2_pad.shape[1]

    # Batch tile: whole (sublane-padded) batch for small B; fixed tile for big B.
    tb = _BATCH_TILE if B > _BATCH_TILE else _round_up(B, SUBLANE)
    Bp = _round_up(B, tb)

    # Pack [x, q, p, 1] into a single lane-dense slab (one input DMA):
    # single concat + single pad, no scatter round trips.
    z = jnp.concatenate(
        [x.astype(jnp.float32), q.astype(jnp.float32), p.astype(jnp.float32),
         jnp.ones((B, 1), jnp.float32)], axis=1)                             # (B, 3N+1)
    z_pad = jnp.pad(z, ((0, Bp - B), (0, Kp - (3 * N + 1))))                 # (Bp, Kp)

    cost = pl.CostEstimate(
        flops=2 * Bp * Kp * Hp + 2 * Bp * Hp * Mp + 5 * Bp * Hp,
        transcendentals=Bp * Hp,
        bytes_accessed=4 * (Bp * Kp + Kp * Hp + Hp * Mp + Bp * Mp))

    if Bp == tb:
        # Single invocation: whole padded arrays live in VMEM.
        vmem = pl.BlockSpec(memory_space=pltpu.MemorySpace.VMEM)
        out = pl.pallas_call(
            _hnn_kernel,
            out_shape=jax.ShapeDtypeStruct((Bp, Mp), jnp.float32),
            in_specs=[vmem, vmem, vmem],
            out_specs=vmem,
            cost_estimate=cost,
        )(z_pad, W1_pad, W2_pad)
    else:
        # Large batch: tile the batch, broadcast the (resident) weights, and let
        # "parallel" semantics shard grid steps across TensorCores (v7x megacore).
        out = pl.pallas_call(
            _hnn_kernel,
            out_shape=jax.ShapeDtypeStruct((Bp, Mp), jnp.float32),
            grid=(Bp // tb,),
            in_specs=[pl.BlockSpec((tb, Kp), lambda i: (i, 0)),
                      pl.BlockSpec((Kp, Hp), lambda i: (0, 0)),
                      pl.BlockSpec((Hp, Mp), lambda i: (0, 0))],
            out_specs=pl.BlockSpec((tb, Mp), lambda i: (i, 0)),
            compiler_params=pltpu.CompilerParams(
                dimension_semantics=("parallel",)),
            cost_estimate=cost,
        )(z_pad, W1_pad, W2_pad)

    qdot = out[:B, :N]           # first output of forward():  -d2H/(dp_i dx_i)
    pdot = out[:B, N:2 * N]      # second output of forward(): -d2H/(dq_i dx_i)
    return qdot, pdot


# ----------------------------------------------------------------------------
# Pure-JAX reference: mirrors the PyTorch module exactly (autograd of H through
# q / p, then per-spatial-index second autograd pass through x, diagonal pick).
# ----------------------------------------------------------------------------
def _reference_forward(x, q, p, Wx, Wq, Wp, b1, w2, b2):
    W1 = jnp.concatenate([Wx, Wq, Wp], axis=1)  # (H, 3N) — H(cat([x, q, p], dim=1))

    def H_sum(xx, qq, pp):
        z = jnp.concatenate([xx, qq, pp], axis=1)           # (B, 3N)
        s = z @ W1.T + b1                                    # (B, H)
        return jnp.sum(jnp.tanh(s) @ w2 + b2)                # scalar (".sum()")

    dH_dq_fn = jax.grad(H_sum, argnums=1)
    dH_dp_fn = jax.grad(H_sum, argnums=2)

    B, N = x.shape
    dH_dq_dx = jnp.zeros((B, N), jnp.float32)
    dH_dp_dx = jnp.zeros((B, N), jnp.float32)
    for i in range(N):
        v = jnp.zeros_like(x).at[:, i].set(1.0)
        _, jq = jax.jvp(lambda xx: dH_dq_fn(xx, q, p), (x,), (v,))
        _, jp = jax.jvp(lambda xx: dH_dp_fn(xx, q, p), (x,), (v,))
        dH_dq_dx = dH_dq_dx.at[:, i].set(jq[:, i])
        dH_dp_dx = dH_dp_dx.at[:, i].set(jp[:, i])
    return -dH_dp_dx, -dH_dq_dx


if __name__ == "__main__":
    B, N, HID = 8, 16, 32  # batch, spatial points, Hamiltonian hidden width

    key = jax.random.PRNGKey(0)
    kx, kq, kp, kw1, kb1, kw2, kb2 = jax.random.split(key, 7)

    x = jax.random.normal(kx, (B, N), jnp.float32)
    q = jax.random.normal(kq, (B, N), jnp.float32)
    p = jax.random.normal(kp, (B, N), jnp.float32)

    # Deterministic parameter init for the Hamiltonian MLP H: R^{3N} -> R
    W1 = 0.3 * jax.random.normal(kw1, (HID, 3 * N), jnp.float32)
    b1 = 0.1 * jax.random.normal(kb1, (HID,), jnp.float32)
    w2 = 0.3 * jax.random.normal(kw2, (HID,), jnp.float32)
    b2 = 0.1 * jax.random.normal(kb2, (), jnp.float32)  # drops out of all derivatives

    Wx, Wq, Wp = W1[:, :N], W1[:, N:2 * N], W1[:, 2 * N:]

    # One-time static weight preparation (transpose / pre-multiply / pad).
    W1_pad, W2_pad = prepare_params(Wx, Wq, Wp, b1, w2)

    qdot, pdot = hnn_1d_wave_separable_forward(x, q, p, W1_pad, W2_pad)
    jax.block_until_ready((qdot, pdot))

    ref_qdot, ref_pdot = _reference_forward(x, q, p, Wx, Wq, Wp, b1, w2, b2)
    np.testing.assert_allclose(np.asarray(qdot), np.asarray(ref_qdot),
                               rtol=1e-4, atol=1e-5)
    np.testing.assert_allclose(np.asarray(pdot), np.asarray(ref_pdot),
                               rtol=1e-4, atol=1e-5)

    print("KERNEL_OK")
</pallas_src>

<mosaic_0001>
module attributes {stable_mosaic.version = 11 : i64} {
  func.func @_hnn_kernel(%arg0: memref<8x128xf32, #tpu.memory_space<vmem>>, %arg1: memref<128x128xf32, #tpu.memory_space<vmem>>, %arg2: memref<128x128xf32, #tpu.memory_space<vmem>>, %arg3: memref<8x128xf32, #tpu.memory_space<vmem>>) attributes {dimension_semantics = [], scalar_prefetch = 0 : i64, scratch_operands = 0 : i64, tpu.core_type = #tpu.core_type<tc>} {
    %c0 = arith.constant 0 : index
    %c0_0 = arith.constant 0 : index
    %0 = vector.load %arg0[%c0, %c0_0] : memref<8x128xf32, #tpu.memory_space<vmem>>, vector<8x128xf32>
    %c0_1 = arith.constant 0 : index
    %c0_2 = arith.constant 0 : index
    %1 = vector.load %arg1[%c0_1, %c0_2] : memref<128x128xf32, #tpu.memory_space<vmem>>, vector<128x128xf32>
    %cst = arith.constant dense<0.000000e+00> : vector<8x128xf32>
    %2 = tpu.matmul %0, %1, %cst {dimension_numbers = #tpu.dot_dimension_numbers<[1], [0], [0], [1], [0, 0, 1, 1], [], []>} : vector<8x128xf32>, vector<128x128xf32>, vector<8x128xf32> -> vector<8x128xf32>
    %3 = math.tanh %2 : vector<8x128xf32>
    %4 = arith.mulf %3, %3 : vector<8x128xf32>
    %cst_3 = arith.constant 1.000000e+00 : f32
    %5 = vector.broadcast %cst_3 : f32 to vector<8x128xf32>
    %6 = arith.subf %4, %5 : vector<8x128xf32>
    %cst_4 = arith.constant 2.000000e+00 : f32
    %7 = vector.broadcast %cst_4 : f32 to vector<8x128xf32>
    %8 = arith.mulf %7, %3 : vector<8x128xf32>
    %9 = arith.mulf %6, %8 : vector<8x128xf32>
    %c0_5 = arith.constant 0 : index
    %c0_6 = arith.constant 0 : index
    %10 = vector.load %arg2[%c0_5, %c0_6] : memref<128x128xf32, #tpu.memory_space<vmem>>, vector<128x128xf32>
    %cst_7 = arith.constant dense<0.000000e+00> : vector<8x128xf32>
    %11 = tpu.matmul %9, %10, %cst_7 {dimension_numbers = #tpu.dot_dimension_numbers<[1], [0], [0], [1], [0, 0, 1, 1], [], []>} : vector<8x128xf32>, vector<128x128xf32>, vector<8x128xf32> -> vector<8x128xf32>
    %c0_8 = arith.constant 0 : index
    %c0_9 = arith.constant 0 : index
    %12 = vector.load %arg3[%c0_8, %c0_9] : memref<8x128xf32, #tpu.memory_space<vmem>>, vector<8x128xf32>
    tpu.vector_store %arg3[%c0_8, %c0_9], %11 {strides = array<i32>} : memref<8x128xf32, #tpu.memory_space<vmem>>, vector<8x128xf32>,
    return
  }
}

</mosaic_0001>

<bundles_post_ra>
// kernel: hnn_1d_wave_separable_forward.1
= control target key start
LH: loop header
LB: loop body
LE: loop exit
PB: predicated region body
PF: predicated region fallthrough
CT: control target
= control target key end

     0   :  { %8 = vsyncpa [#allocation3], 0  ;;  %s510_s0 = inlined_call_operand.vmem [shape: f32[8,128], index: 0, kind: input, shape index: {}]   ;;  %s511_s1 = inlined_call_operand.hbm [shape: f32[128,128], index: 1, kind: input, shape index: {}]   ;;  %s512_s2 = inlined_call_operand.hbm [shape: f32[128,128], index: 2, kind: input, shape index: {}]   ;;  %s513_s3 = inlined_call_operand.vmem [shape: f32[8,128], index: 3, kind: output, shape index: {}]  }
   0x1   :  { %9 = vsyncpa [#allocation5], 0  ;;  %s437_s12 = smov [#allocation2]   ;;  %s389_s16 = scalar_lea.hbm %s511_s1, 2048 }
   0x2   :  { %s17_s13 = sshll.u32 %s437_s12, 4  ;;  %p390_p0 = scmp.ne.s32.totalorder %s511_s1, %s389_s16  ;;  %s18_s13 = int_to_ptr.vmem [resolvable:$true] %s17_s13 }
   0x3   :  { %p393_p1 = scmp.lt.u32.totalorder %s389_s16, %s511_s1 }
   0x5   :  { %p395_p2 = pnand %p393_p1, %p390_p0 }
   0x7   :  { %398 = shalt.err (!%p395_p2)
}
   0x8   :  { %s399_s21 = scalar_lea.vmem %s18_s13, 2048  ;;  %p404_p4 = scmp.lt.s32.totalorder %s18_s13, %s18_s13 }
   0x9   :  { %p400_p3 = scmp.ne.s32.totalorder %s18_s13, %s399_s21  ;;  %p405_p5 = scmp.lt.s32.totalorder %s399_s21, %s399_s21 }
   0xb   :  { %p406_p6 = por %p405_p5, %p404_p4 }
   0xd   :  { %p407_p7 = pnand %p406_p6, %p400_p3 }
   0xf   :  { %410 = shalt.err (!%p407_p7)
}
  0x10   :  { %s438_s22 = smov 128   ;;  %s439_s23 = smov 8  }
  0x11   :  { %23 = dma.hbm_to_vmem [thread:$0]  %s511_s1, 2048, %s18_s13, [#allocation3], %s438_s22, %s438_s22, %s439_s23  }
  0x12   :  { %s440_s26 = smov [#allocation4]   ;;  %s411_s30 = scalar_lea.hbm %s512_s2, 2048 }
  0x13   :  { %s29_s27 = sshll.u32 %s440_s26, 4  ;;  %p412_p8 = scmp.ne.s32.totalorder %s512_s2, %s411_s30  ;;  %s30_s27 = int_to_ptr.vmem [resolvable:$true] %s29_s27 }
  0x14   :  { %p415_p9 = scmp.lt.u32.totalorder %s411_s30, %s512_s2 }
  0x16   :  { %p417_p10 = pnand %p415_p9, %p412_p8 }
  0x18   :  { %420 = shalt.err (!%p417_p10)
}
  0x19   :  { %s421_s8 = scalar_lea.vmem %s30_s27, 2048  ;;  %p426_p12 = scmp.lt.s32.totalorder %s30_s27, %s30_s27 }
  0x1a   :  { %p422_p11 = scmp.ne.s32.totalorder %s30_s27, %s421_s8  ;;  %p427_p13 = scmp.lt.s32.totalorder %s421_s8, %s421_s8 }
  0x1c   :  { %p428_p0 = por %p427_p13, %p426_p12 }
  0x1e   :  { %p429_p1 = pnand %p428_p0, %p422_p11 }
  0x20   :  { %432 = shalt.err (!%p429_p1)
}
  0x21   :  { %35 = dma.hbm_to_vmem [thread:$0]  %s512_s2, 2048, %s30_s27, [#allocation5], %s438_s22, %s438_s22, %s439_s23  }
  0x22   :  { %433 = dma.done.wait [#allocation3], 2048  }
  0x23   :  { %434 = vsyncadd [#allocation3], 4294965248 }
  0x24   :  { %435 = dma.done.wait [#allocation5], 2048  }
  0x25   :  { %436 = vsyncadd [#allocation5], 4294965248  ;;  %v441_v0 = vmov 0.0|0.0   ;;  %vm442_vm0 = vmmov 0   ;;  %v443_v1 = vmov 0.0   ;;  %v43_v2 = vld [vmem:[#allocation2] sm:$0xff] }
  0x26   :  { %332 = vmatprep.subr.bf16.mxu0 %v441_v0  ;;  %294 = vmatprep.mubr.msk.f32.mxu0 %vm442_vm0, %v443_v1  ;;  %v44_v3 = vld [vmem:[#allocation2 + $0x8] sm:$0xff]  ;;  %v45_v4 = vld [vmem:[#allocation2 + $0x10] sm:$0xff]  ;;  %v46_v6 = vld [vmem:[#allocation2 + $0x18] sm:$0xff] }
  0x27   :  { %356 = vmatprep.subr.bf16.mxu1 %v441_v0  ;;  %329 = vmatprep.mubr.msk.f32.mxu1 %vm442_vm0, %v443_v1  ;;  %v333_v5 = vpack.c.bf16 %v44_v3, %v43_v2  ;;  %v336_v7 = vpack.c.bf16 %v46_v6, %v45_v4  ;;  %v47_v8 = vld [vmem:[#allocation2 + $0x20] sm:$0xff]  ;;  %v48_v9 = vld [vmem:[#allocation2 + $0x28] sm:$0xff]  ;;  %v136_v12 = vld [vmem:[#allocation4 + $0x10] sm:$0xff] }
  0x28   :  { %v134_v10 = vld [vmem:[#allocation4] sm:$0xff]  ;;  %v135_v11 = vld [vmem:[#allocation4 + $0x8] sm:$0xff]  ;;  %v137_v13 = vld [vmem:[#allocation4 + $0x18] sm:$0xff]  ;;  %v339_v14 = vpack.c.bf16 %v48_v9, %v47_v8 }
  0x29   :  { %334 = vmatpush3.bf16.msra.mxu0 %v333_v5  ;;  %v357_v15 = vpack.c.bf16 %v135_v11, %v134_v10  ;;  %v49_v16 = vld [vmem:[#allocation2 + $0x30] sm:$0xff]  ;;  %v50_v17 = vld [vmem:[#allocation2 + $0x38] sm:$0xff]  ;;  %v360_v18 = vpack.c.bf16 %v137_v13, %v136_v12  ;;  %v138_v19 = vld [vmem:[#allocation4 + $0x20] sm:$0xff] }
  0x2a   :  { %335 = vmatprep.subr.bf16.mxu0 %v441_v0  ;;  %v139_v20 = vld [vmem:[#allocation4 + $0x28] sm:$0xff]  ;;  %v342_v21 = vpack.c.bf16 %v50_v17, %v49_v16  ;;  %v51_v22 = vld [vmem:[#allocation2 + $0x40] sm:$0xff]  ;;  %v140_v25 = vld [vmem:[#allocation4 + $0x30] sm:$0xff] }
  0x2b   :  { %358 = vmatpush3.bf16.msra.mxu1 %v357_v15  ;;  %v52_v23 = vld [vmem:[#allocation2 + $0x48] sm:$0xff]  ;;  %v363_v24 = vpack.c.bf16 %v139_v20, %v138_v19  ;;  %v141_v26 = vld [vmem:[#allocation4 + $0x38] sm:$0xff]  ;;  %v53_v28 = vld [vmem:[#allocation2 + $0x50] sm:$0xff] }
  0x2c   :  { %359 = vmatprep.subr.bf16.mxu1 %v441_v0  ;;  %v345_v27 = vpack.c.bf16 %v52_v23, %v51_v22  ;;  %v54_v29 = vld [vmem:[#allocation2 + $0x58] sm:$0xff]  ;;  %v366_v30 = vpack.c.bf16 %v141_v26, %v140_v25  ;;  %v55_v32 = vld [vmem:[#allocation2 + $0x60] sm:$0xff]  ;;  %v56_v33 = vld [vmem:[#allocation2 + $0x68] sm:$0xff] }
  0x2d   :  { %337 = vmatpush3.bf16.msra.mxu0 %v336_v7  ;;  %v348_v31 = vpack.c.bf16 %v54_v29, %v53_v28  ;;  %v351_v34 = vpack.c.bf16 %v56_v33, %v55_v32  ;;  %v57_v35 = vld [vmem:[#allocation2 + $0x70] sm:$0xff]  ;;  %v58_v36 = vld [vmem:[#allocation2 + $0x78] sm:$0xff]  ;;  %v42_v38 = vld [vmem:[%s510_s0] sm:$0xff] }
  0x2e   :  { %338 = vmatprep.subr.bf16.mxu0 %v441_v0  ;;  %v354_v37 = vpack.c.bf16 %v58_v36, %v57_v35  ;;  %v142_v39 = vld [vmem:[#allocation4 + $0x40] sm:$0xff]  ;;  %v143_v40 = vld [vmem:[#allocation4 + $0x48] sm:$0xff]  ;;  %v144_v42 = vld [vmem:[#allocation4 + $0x50] sm:$0xff] }
  0x2f   :  { %361 = vmatpush3.bf16.msra.mxu1 %v360_v18  ;;  %v369_v41 = vpack.c.bf16 %v143_v40, %v142_v39  ;;  %v145_v43 = vld [vmem:[#allocation4 + $0x58] sm:$0xff]  ;;  %v146_v45 = vld [vmem:[#allocation4 + $0x60] sm:$0xff]  ;;  %v147_v46 = vld [vmem:[#allocation4 + $0x68] sm:$0xff] }
  0x30   :  { %362 = vmatprep.subr.bf16.mxu1 %v441_v0  ;;  %v372_v44 = vpack.c.bf16 %v145_v43, %v144_v42  ;;  %v375_v47 = vpack.c.bf16 %v147_v46, %v146_v45  ;;  %v148_v48 = vld [vmem:[#allocation4 + $0x70] sm:$0xff]  ;;  %v149_v49 = vld [vmem:[#allocation4 + $0x78] sm:$0xff] }
  0x31   :  { %340 = vmatpush3.bf16.msra.mxu0 %v339_v14  ;;  %v378_v50 = vpack.c.bf16 %v149_v49, %v148_v48 }
  0x32   :  { %341 = vmatprep.subr.bf16.mxu0 %v441_v0 }
  0x33   :  { %364 = vmatpush3.bf16.msra.mxu1 %v363_v24 }
  0x34   :  { %365 = vmatprep.subr.bf16.mxu1 %v441_v0 }
  0x35   :  { %343 = vmatpush3.bf16.msra.mxu0 %v342_v21 }
  0x36   :  { %344 = vmatprep.subr.bf16.mxu0 %v441_v0 }
  0x37   :  { %367 = vmatpush3.bf16.msra.mxu1 %v366_v30 }
  0x38   :  { %368 = vmatprep.subr.bf16.mxu1 %v441_v0 }
  0x39   :  { %346 = vmatpush3.bf16.msra.mxu0 %v345_v27 }
  0x3a   :  { %347 = vmatprep.subr.bf16.mxu0 %v441_v0 }
  0x3b   :  { %370 = vmatpush3.bf16.msra.mxu1 %v369_v41 }
  0x3c   :  { %371 = vmatprep.subr.bf16.mxu1 %v441_v0 }
  0x3d   :  { %349 = vmatpush3.bf16.msra.mxu0 %v348_v31 }
  0x3e   :  { %350 = vmatprep.subr.bf16.mxu0 %v441_v0 }
  0x3f   :  { %373 = vmatpush3.bf16.msra.mxu1 %v372_v44 }
  0x40   :  { %374 = vmatprep.subr.bf16.mxu1 %v441_v0 }
  0x41   :  { %352 = vmatpush3.bf16.msra.mxu0 %v351_v34 }
  0x42   :  { %353 = vmatprep.subr.bf16.mxu0 %v441_v0 }
  0x43   :  { %376 = vmatpush3.bf16.msra.mxu1 %v375_v47 }
  0x44   :  { %377 = vmatprep.subr.bf16.mxu1 %v441_v0 }
  0x45   :  { %355 = vmatpush3.bf16.msra.mxu0 %v354_v37 }
  0x47   :  { %379 = vmatpush3.bf16.msra.mxu1 %v378_v50 }
  0x48   :  { %295 = vmatmul.mubr.f32.vlgmr.msra.gmra.mrb[0].mxu0 %v42_v38 }
 0x11b   :  { %v125_v51 = vpop.f32.mrb[0].mxu0 }
 0x11c   :  { %387 = vtanh.f32 %v125_v51  ;;  %v296_v52 = vpop.f32.mrb[1].mxu0 }
 0x126   :  { %v388_v53 = vpop.eup %387 }
 0x127   :  { %v130_v54 = vmul.f32 %v388_v53, %v388_v53  ;;  %v132_v56 = vmul.f32 2.0, %v388_v53 }
 0x129   :  { %v227_v55 = vadd.f32 -1.0, %v130_v54 }
 0x12b   :  { %v133_v57 = vmul.f32 %v227_v55, %v132_v56 }
 0x12d   :  { %330 = vmatmul.mubr.f32.vlgmr.msra.gmra.mrb[0].mxu1 %v133_v57 }
 0x200   :  { %v216_v58 = vpop.f32.mrb[0].mxu1 }
 0x201   :  { %220 = vst [vmem:[%s513_s3] sm:$0xff] %v216_v58  ;;  %v331_v59 = vpop.f32.mrb[1].mxu1 }
 0x202   :  { %225 = vsyncpa [#allocation3], 1 }
 0x203   :  { %226 = vsyncpa [#allocation5], 1 }

</bundles_post_ra>
